<compile_context>
chip_gen: v7x
topology: tpu7x:2x2x1
jax: 0.10.0
libtpu: 0.0.40
codegen_flags: <defaults>
</compile_context>

<pallas_src>
import functools
import math

import jax
import jax.numpy as jnp
from jax.experimental import pallas as pl
from jax.experimental.pallas import tpu as pltpu


def _msa_kernel(x_ref, w_ref, b_ref, o_ref, acc_ref, *, n_heads, d, H, H_pad):
    bt, S, _ = x_ref.shape
    x = x_ref[...].astype(jnp.bfloat16)                 # (bt, S, Hp)  bf16 for MXU
    w = w_ref[...]                                      # (Hp, 3Hp)    bf16, VMEM-resident
    b = b_ref[...]                                      # (1, 3Hp)     f32,  VMEM-resident

    # Single wide MXU matmul producing Q, K, V for every head (bf16 in, f32 acc).
    # The (bt, S) -> (bt*S) collapse is tile-preserving (S % 8 == 0 or bt == 1).
    x2 = x.reshape(bt * S, H_pad)
    qkv = jnp.dot(x2, w, preferred_element_type=jnp.float32) + b    # (bt*S, 3Hp) f32
    qkv = qkv.reshape(bt, S, 3 * H_pad)

    # TODO(synk): for large S, tile the KV axis with an online-softmax (flash)
    # accumulator instead of materializing (S, S) scores; for H above one MXU
    # tile, switch the block-diag fused weight to a head-batched (n_heads, d, 3d)
    # weight to avoid n_heads x redundant MXU work.
    for h in range(n_heads):                            # static, small
        q = qkv[:, :, h * d:(h + 1) * d].astype(jnp.bfloat16)       # scale pre-folded
        k = qkv[:, :, H_pad + h * d:H_pad + (h + 1) * d].astype(jnp.bfloat16)
        v = qkv[:, :, 2 * H_pad + h * d:2 * H_pad + (h + 1) * d].astype(jnp.bfloat16)

        # q @ k^T without materializing a transpose of k; bf16 in, f32 acc.
        s = jnp.einsum('bqd,bkd->bqk', q, k, preferred_element_type=jnp.float32)

        # Numerically stable softmax in f32; divide goes to the (idle) EUP.
        m = jnp.max(s, axis=-1, keepdims=True)
        e = jnp.exp(s - m)
        denom = jnp.sum(e, axis=-1, keepdims=True)
        attn = (e * pl.reciprocal(denom, approx=True)).astype(jnp.bfloat16)

        # Write this head directly into the scratch accumulator (no concat).
        acc_ref[:, :, h * d:(h + 1) * d] = jnp.einsum(
            'bqk,bkd->bqd', attn, v, preferred_element_type=jnp.float32)

    if H_pad > H:  # keep lane padding deterministic (sliced off host-side)
        acc_ref[:, :, H:H_pad] = jnp.zeros((bt, S, H_pad - H), jnp.float32)

    # One lane-dense store of all heads back into the (B, S, H_pad) layout.
    o_ref[...] = acc_ref[...].astype(o_ref.dtype)


def _block_diag(w):
    """(n_heads, d, d) -> (n_heads*d, n_heads*d) block-diagonal matrix."""
    nh, d, _ = w.shape
    eye = jnp.eye(nh, dtype=w.dtype)                       # (nh, nh)
    # out[h*d+i, g*d+j] = eye[h, g] * w[h, i, j]
    return (eye[:, None, :, None] * w[:, :, None, :]).reshape(nh * d, nh * d)


def _pick_batch_tile(B, S):
    """Batch elements per grid step."""
    if S % 8 != 0:
        return 1                       # keep the in-kernel (bt*S, H) reshape tile-aligned
    bt = min(B, max(1, 512 // S))      # ~512 rows/step amortizes the ~0.35us/step overhead
    if B >= 2:
        bt = min(bt, max(1, B // 2))   # keep >=2 grid steps so v7x's 2nd TC has work
    while B % bt:                      # bt must divide B
        bt -= 1
    return bt


def msa_pallas(x, wq, wk, wv, bq, bk, bv, n_heads, batch_tile=None):
    """x: (B, S, H); wq/wk/wv: (n_heads, d, d) (pre-transposed, y = x @ w + b);
    bq/bk/bv: (n_heads, 1, d).  Returns (B, S, H)."""
    B, S, H = x.shape
    assert H % n_heads == 0
    d = H // n_heads
    H_pad = -(-H // 128) * 128         # lane-dense loads/stores (biggest measured lever)
    scale = 1.0 / math.sqrt(float(d))

    bt = _pick_batch_tile(B, S) if batch_tile is None else batch_tile
    assert B % bt == 0

    def pad_hh(m):                     # (H, H) -> (H_pad, H_pad)
        return jnp.pad(m, ((0, H_pad - H), (0, H_pad - H)))

    def pad_h(v):                      # (1, H) -> (1, H_pad)
        return jnp.pad(v, ((0, 0), (0, H_pad - H)))

    # Host-side fusion of 3*n_heads per-head Linears into one block-diagonal
    # matmul; the 1/sqrt(d) score scale is folded into the Q weight/bias.
    w_qkv = jnp.concatenate(
        [pad_hh(_block_diag(wq) * scale),
         pad_hh(_block_diag(wk)),
         pad_hh(_block_diag(wv))], axis=1).astype(jnp.bfloat16)     # (Hp, 3Hp) bf16
    b_qkv = jnp.concatenate(
        [pad_h(bq.reshape(1, H) * scale),
         pad_h(bk.reshape(1, H)),
         pad_h(bv.reshape(1, H))], axis=1).astype(jnp.float32)      # (1, 3Hp)  f32

    x_pad = jnp.pad(x, ((0, 0), (0, 0), (0, H_pad - H))) if H_pad != H else x

    kernel = functools.partial(_msa_kernel, n_heads=n_heads, d=d, H=H, H_pad=H_pad)

    flops_per_seq = 2 * S * H_pad * 3 * H_pad + n_heads * 4 * S * S * d
    cost = pl.CostEstimate(
        flops=B * flops_per_seq,
        transcendentals=B * n_heads * (S * S + S),
        bytes_accessed=2 * B * S * H_pad * 4 + H_pad * 3 * H_pad * 2 + 3 * H_pad * 4,
    )

    out_pad = pl.pallas_call(
        kernel,
        out_shape=jax.ShapeDtypeStruct((B, S, H_pad), x.dtype),
        grid_spec=pltpu.PrefetchScalarGridSpec(
            num_scalar_prefetch=0,
            grid=(B // bt,),
            in_specs=[
                # x: (bt, S, H_pad) slab per step, lane-dense, no host transpose.
                pl.BlockSpec((bt, S, H_pad), lambda i: (i, 0, 0)),
                # Fused weight/bias: constant block index -> DMA'd once, stays
                # VMEM-resident across grid steps.
                # TODO(synk): single-buffer these (pipeline_mode=pl.Buffered(1))
                # on v7x once H is large enough for the second buffer to matter.
                pl.BlockSpec((H_pad, 3 * H_pad), lambda i: (0, 0)),
                pl.BlockSpec((1, 3 * H_pad), lambda i: (0, 0)),
            ],
            out_specs=pl.BlockSpec((bt, S, H_pad), lambda i: (i, 0, 0)),
            scratch_shapes=[pltpu.VMEM((bt, S, H_pad), jnp.float32)],
        ),
        compiler_params=pltpu.CompilerParams(
            dimension_semantics=("parallel",),
            # Re-derive when scaling S/H (v7x has only 64 MiB VMEM per TensorCore).
            vmem_limit_bytes=64 * 1024 * 1024,
        ),
        cost_estimate=cost,
    )(x_pad, w_qkv, b_qkv)

    return out_pad[:, :, :H] if H_pad != H else out_pad


def msa_reference(x, wq, wk, wv, bq, bk, bv, n_heads):
    """Pure-JAX reference mirroring the PyTorch loop semantics."""
    B, S, H = x.shape
    d = H // n_heads
    outs = []
    for b in range(B):
        heads = []
        for h in range(n_heads):
            seq = x[b, :, h * d:(h + 1) * d]
            q = seq @ wq[h] + bq[h]
            k = seq @ wk[h] + bk[h]
            v = seq @ wv[h] + bv[h]
            attn = jax.nn.softmax(q @ k.T / math.sqrt(d), axis=-1)
            heads.append(attn @ v)
        outs.append(jnp.concatenate(heads, axis=-1))
    return jnp.stack(outs, axis=0)


if __name__ == "__main__":
    # Small shapes consistent with the module: batch=2, seq=8, hid_d=32, heads=2.
    B, S, hid_d, n_heads = 2, 8, 32, 2
    d = hid_d // n_heads

    key = jax.random.PRNGKey(0)
    kx, kwq, kwk, kwv, kbq, kbk, kbv = jax.random.split(key, 7)

    x = jax.random.normal(kx, (B, S, hid_d), dtype=jnp.float32)

    # Deterministic parameter init (nn.Linear-style uniform +-1/sqrt(in)).
    bound = 1.0 / math.sqrt(d)
    # Stored already transposed so the kernel computes y = x @ w + b
    # (equivalent to PyTorch's x @ W.T + b with W = w.T).
    wq = jax.random.uniform(kwq, (n_heads, d, d), jnp.float32, -bound, bound)
    wk = jax.random.uniform(kwk, (n_heads, d, d), jnp.float32, -bound, bound)
    wv = jax.random.uniform(kwv, (n_heads, d, d), jnp.float32, -bound, bound)
    bq = jax.random.uniform(kbq, (n_heads, 1, d), jnp.float32, -bound, bound)
    bk = jax.random.uniform(kbk, (n_heads, 1, d), jnp.float32, -bound, bound)
    bv = jax.random.uniform(kbv, (n_heads, 1, d), jnp.float32, -bound, bound)

    out = msa_pallas(x, wq, wk, wv, bq, bk, bv, n_heads)
    out = jax.block_until_ready(out)

    ref = msa_reference(x, wq, wk, wv, bq, bk, bv, n_heads)
    assert out.shape == (B, S, hid_d), out.shape
    # Tolerance absorbs bf16 MXU operands + EUP approximate reciprocal in softmax.
    assert jnp.allclose(out, ref, atol=3e-2, rtol=3e-2), "mismatch vs reference"

    print("KERNEL_OK")
</pallas_src>

<mosaic_0001>
module attributes {stable_mosaic.version = 11 : i64} {
  func.func @_msa_kernel(%arg0: i32, %arg1: memref<1x8x128xf32, #tpu.memory_space<vmem>>, %arg2: memref<128x384xbf16, #tpu.memory_space<vmem>>, %arg3: memref<1x384xf32, #tpu.memory_space<vmem>>, %arg4: memref<1x8x128xf32, #tpu.memory_space<vmem>>, %arg5: memref<1x8x128xf32, #tpu.memory_space<vmem>>) attributes {dimension_semantics = [#tpu.dimension_semantics<parallel>], iteration_bounds = array<i64: 2>, scalar_prefetch = 0 : i64, scratch_operands = 1 : i64, tpu.core_type = #tpu.core_type<tc>, window_params = [{transform_indices = @transform_0, window_bounds = array<i64: 1, 8, 128>}, {pipeline_mode = #tpu.pipeline_mode<synchronous>, transform_indices = @transform_1, window_bounds = array<i64: 128, 384>}, {pipeline_mode = #tpu.pipeline_mode<synchronous>, transform_indices = @transform_2, window_bounds = array<i64: 1, 384>}, {transform_indices = @transform_3, window_bounds = array<i64: 1, 8, 128>}]} {
    %c0 = arith.constant 0 : index
    %c0_0 = arith.constant 0 : index
    %c0_1 = arith.constant 0 : index
    %0 = vector.load %arg1[%c0, %c0_0, %c0_1] : memref<1x8x128xf32, #tpu.memory_space<vmem>>, vector<1x8x128xf32>
    %1 = arith.truncf %0 : vector<1x8x128xf32> to vector<1x8x128xbf16>
    %c0_2 = arith.constant 0 : index
    %c0_3 = arith.constant 0 : index
    %2 = vector.load %arg2[%c0_2, %c0_3] : memref<128x384xbf16, #tpu.memory_space<vmem>>, vector<128x384xbf16>
    %c0_4 = arith.constant 0 : index
    %c0_5 = arith.constant 0 : index
    %3 = vector.load %arg3[%c0_4, %c0_5] : memref<1x384xf32, #tpu.memory_space<vmem>>, vector<1x384xf32>
    %4 = vector.shape_cast %1 : vector<1x8x128xbf16> to vector<8x128xbf16>
    %cst = arith.constant dense<0.000000e+00> : vector<8x384xf32>
    %5 = tpu.matmul %4, %2, %cst {dimension_numbers = #tpu.dot_dimension_numbers<[1], [0], [0], [1], [0, 0, 1, 1], [], []>} : vector<8x128xbf16>, vector<128x384xbf16>, vector<8x384xf32> -> vector<8x384xf32>
    %6 = vector.broadcast %3 : vector<1x384xf32> to vector<8x384xf32>
    %7 = arith.addf %5, %6 : vector<8x384xf32>
    %8 = vector.shape_cast %7 : vector<8x384xf32> to vector<1x8x384xf32>
    %9 = vector.extract_strided_slice %8 {offsets = [0, 0, 0], sizes = [1, 8, 16], strides = [1, 1, 1]} : vector<1x8x384xf32> to vector<1x8x16xf32>
    %10 = arith.truncf %9 : vector<1x8x16xf32> to vector<1x8x16xbf16>
    %11 = vector.extract_strided_slice %8 {offsets = [0, 0, 128], sizes = [1, 8, 16], strides = [1, 1, 1]} : vector<1x8x384xf32> to vector<1x8x16xf32>
    %12 = arith.truncf %11 : vector<1x8x16xf32> to vector<1x8x16xbf16>
    %13 = vector.extract_strided_slice %8 {offsets = [0, 0, 256], sizes = [1, 8, 16], strides = [1, 1, 1]} : vector<1x8x384xf32> to vector<1x8x16xf32>
    %14 = arith.truncf %13 : vector<1x8x16xf32> to vector<1x8x16xbf16>
    "tpu.trace_start"() <{level = 10 : i32, message = "bqd,bkd->bqk"}> : () -> ()
    %cst_6 = arith.constant dense<0.000000e+00> : vector<1x8x8xf32>
    %15 = tpu.matmul %10, %12, %cst_6 {dimension_numbers = #tpu.dot_dimension_numbers<[2], [2], [1], [1], [0, 0, 0, 1, 1, 1], [0], [0]>} : vector<1x8x16xbf16>, vector<1x8x16xbf16>, vector<1x8x8xf32> -> vector<1x8x8xf32>
    "tpu.trace_stop"() : () -> ()
    %cst_7 = arith.constant dense<0xFF800000> : vector<1x8xf32>
    %16 = vector.multi_reduction <maximumf>, %15, %cst_7 [2] : vector<1x8x8xf32> to vector<1x8xf32>
    %17 = vector.shape_cast %16 : vector<1x8xf32> to vector<1x8x1xf32>
    %18 = vector.broadcast %17 : vector<1x8x1xf32> to vector<1x8x8xf32>
    %19 = arith.subf %15, %18 : vector<1x8x8xf32>
    %20 = math.exp %19 : vector<1x8x8xf32>
    %cst_8 = arith.constant dense<0.000000e+00> : vector<1x8xf32>
    %21 = vector.multi_reduction <add>, %20, %cst_8 [2] : vector<1x8x8xf32> to vector<1x8xf32>
    %22 = vector.shape_cast %21 : vector<1x8xf32> to vector<1x8x1xf32>
    %23 = tpu.reciprocal %22 {approx = true} : vector<1x8x1xf32> -> vector<1x8x1xf32>
    %24 = vector.broadcast %23 : vector<1x8x1xf32> to vector<1x8x8xf32>
    %25 = arith.mulf %20, %24 : vector<1x8x8xf32>
    %26 = arith.truncf %25 : vector<1x8x8xf32> to vector<1x8x8xbf16>
    "tpu.trace_start"() <{level = 10 : i32, message = "bqk,bkd->bqd"}> : () -> ()
    %cst_9 = arith.constant dense<0.000000e+00> : vector<1x8x16xf32>
    %27 = tpu.matmul %26, %14, %cst_9 {dimension_numbers = #tpu.dot_dimension_numbers<[2], [1], [1], [2], [0, 0, 0, 1, 1, 2], [0], [0]>} : vector<1x8x8xbf16>, vector<1x8x16xbf16>, vector<1x8x16xf32> -> vector<1x8x16xf32>
    "tpu.trace_stop"() : () -> ()
    %c0_10 = arith.constant 0 : index
    %c0_11 = arith.constant 0 : index
    %c0_12 = arith.constant 0 : index
    %28 = vector.load %arg5[%c0_10, %c0_11, %c0_12] : memref<1x8x128xf32, #tpu.memory_space<vmem>>, vector<1x8x16xf32>
    tpu.vector_store %arg5[%c0_10, %c0_11, %c0_12], %27 {strides = array<i32>} : memref<1x8x128xf32, #tpu.memory_space<vmem>>, vector<1x8x16xf32>,
    %29 = vector.extract_strided_slice %8 {offsets = [0, 0, 16], sizes = [1, 8, 16], strides = [1, 1, 1]} : vector<1x8x384xf32> to vector<1x8x16xf32>
    %30 = arith.truncf %29 : vector<1x8x16xf32> to vector<1x8x16xbf16>
    %31 = vector.extract_strided_slice %8 {offsets = [0, 0, 144], sizes = [1, 8, 16], strides = [1, 1, 1]} : vector<1x8x384xf32> to vector<1x8x16xf32>
    %32 = arith.truncf %31 : vector<1x8x16xf32> to vector<1x8x16xbf16>
    %33 = vector.extract_strided_slice %8 {offsets = [0, 0, 272], sizes = [1, 8, 16], strides = [1, 1, 1]} : vector<1x8x384xf32> to vector<1x8x16xf32>
    %34 = arith.truncf %33 : vector<1x8x16xf32> to vector<1x8x16xbf16>
    "tpu.trace_start"() <{level = 10 : i32, message = "bqd,bkd->bqk"}> : () -> ()
    %cst_13 = arith.constant dense<0.000000e+00> : vector<1x8x8xf32>
    %35 = tpu.matmul %30, %32, %cst_13 {dimension_numbers = #tpu.dot_dimension_numbers<[2], [2], [1], [1], [0, 0, 0, 1, 1, 1], [0], [0]>} : vector<1x8x16xbf16>, vector<1x8x16xbf16>, vector<1x8x8xf32> -> vector<1x8x8xf32>
    "tpu.trace_stop"() : () -> ()
    %cst_14 = arith.constant dense<0xFF800000> : vector<1x8xf32>
    %36 = vector.multi_reduction <maximumf>, %35, %cst_14 [2] : vector<1x8x8xf32> to vector<1x8xf32>
    %37 = vector.shape_cast %36 : vector<1x8xf32> to vector<1x8x1xf32>
    %38 = vector.broadcast %37 : vector<1x8x1xf32> to vector<1x8x8xf32>
    %39 = arith.subf %35, %38 : vector<1x8x8xf32>
    %40 = math.exp %39 : vector<1x8x8xf32>
    %cst_15 = arith.constant dense<0.000000e+00> : vector<1x8xf32>
    %41 = vector.multi_reduction <add>, %40, %cst_15 [2] : vector<1x8x8xf32> to vector<1x8xf32>
    %42 = vector.shape_cast %41 : vector<1x8xf32> to vector<1x8x1xf32>
    %43 = tpu.reciprocal %42 {approx = true} : vector<1x8x1xf32> -> vector<1x8x1xf32>
    %44 = vector.broadcast %43 : vector<1x8x1xf32> to vector<1x8x8xf32>
    %45 = arith.mulf %40, %44 : vector<1x8x8xf32>
    %46 = arith.truncf %45 : vector<1x8x8xf32> to vector<1x8x8xbf16>
    "tpu.trace_start"() <{level = 10 : i32, message = "bqk,bkd->bqd"}> : () -> ()
    %cst_16 = arith.constant dense<0.000000e+00> : vector<1x8x16xf32>
    %47 = tpu.matmul %46, %34, %cst_16 {dimension_numbers = #tpu.dot_dimension_numbers<[2], [1], [1], [2], [0, 0, 0, 1, 1, 2], [0], [0]>} : vector<1x8x8xbf16>, vector<1x8x16xbf16>, vector<1x8x16xf32> -> vector<1x8x16xf32>
    "tpu.trace_stop"() : () -> ()
    %c0_17 = arith.constant 0 : index
    %c0_18 = arith.constant 0 : index
    %c16 = arith.constant 16 : index
    %48 = vector.load %arg5[%c0_17, %c0_18, %c16] : memref<1x8x128xf32, #tpu.memory_space<vmem>>, vector<1x8x16xf32>
    tpu.vector_store %arg5[%c0_17, %c0_18, %c16], %47 {strides = array<i32>} : memref<1x8x128xf32, #tpu.memory_space<vmem>>, vector<1x8x16xf32>,
    %cst_19 = arith.constant 0.000000e+00 : f32
    %49 = vector.broadcast %cst_19 : f32 to vector<1x8x96xf32>
    %c0_20 = arith.constant 0 : index
    %c0_21 = arith.constant 0 : index
    %c32 = arith.constant 32 : index
    %50 = vector.load %arg5[%c0_20, %c0_21, %c32] : memref<1x8x128xf32, #tpu.memory_space<vmem>>, vector<1x8x96xf32>
    tpu.vector_store %arg5[%c0_20, %c0_21, %c32], %49 {strides = array<i32>} : memref<1x8x128xf32, #tpu.memory_space<vmem>>, vector<1x8x96xf32>,
    %c0_22 = arith.constant 0 : index
    %c0_23 = arith.constant 0 : index
    %c0_24 = arith.constant 0 : index
    %51 = vector.load %arg5[%c0_22, %c0_23, %c0_24] : memref<1x8x128xf32, #tpu.memory_space<vmem>>, vector<1x8x128xf32>
    %c0_25 = arith.constant 0 : index
    %c0_26 = arith.constant 0 : index
    %c0_27 = arith.constant 0 : index
    %52 = vector.load %arg4[%c0_25, %c0_26, %c0_27] : memref<1x8x128xf32, #tpu.memory_space<vmem>>, vector<1x8x128xf32>
    tpu.vector_store %arg4[%c0_25, %c0_26, %c0_27], %51 {strides = array<i32>} : memref<1x8x128xf32, #tpu.memory_space<vmem>>, vector<1x8x128xf32>,
    return
  }
  func.func @transform_0(%arg0: i32) -> (i32, i32, i32) {
    %c0_i32 = arith.constant 0 : i32
    %c0_i32_0 = arith.constant 0 : i32
    %c0_i32_1 = arith.constant 0 : i32
    return %arg0, %c0_i32, %c0_i32_0 : i32, i32, i32
  }
  func.func @transform_1(%arg0: i32) -> (i32, i32) {
    %c0_i32 = arith.constant 0 : i32
    %c0_i32_0 = arith.constant 0 : i32
    %c0_i32_1 = arith.constant 0 : i32
    return %c0_i32, %c0_i32_0 : i32, i32
  }
  func.func @transform_2(%arg0: i32) -> (i32, i32) {
    %c0_i32 = arith.constant 0 : i32
    %c0_i32_0 = arith.constant 0 : i32
    %c0_i32_1 = arith.constant 0 : i32
    return %c0_i32, %c0_i32_0 : i32, i32
  }
  func.func @transform_3(%arg0: i32) -> (i32, i32, i32) {
    %c0_i32 = arith.constant 0 : i32
    %c0_i32_0 = arith.constant 0 : i32
    %c0_i32_1 = arith.constant 0 : i32
    return %arg0, %c0_i32, %c0_i32_0 : i32, i32, i32
  }
}

</mosaic_0001>

<bundles_post_ra>
// kernel: tpu_custom_call.1
= control target key start
LH: loop header
LB: loop body
LE: loop exit
PB: predicated region body
PF: predicated region fallthrough
CT: control target
= control target key end

     0   :  { %8 = vsyncpa [#allocation4], 0  ;;  %s1505_s0 = inlined_call_operand.hbm [shape: f32[2,8,128], index: 0, kind: input, shape index: {}]   ;;  %s1506_s1 = inlined_call_operand.hbm [shape: bf16[128,384], index: 1, kind: input, shape index: {}]   ;;  %s1507_s2 = inlined_call_operand.hbm [shape: f32[1,384], index: 2, kind: input, shape index: {}]   ;;  %s1508_s3 = inlined_call_operand.hbm [shape: f32[2,8,128], index: 3, kind: output, shape index: {}]  }
   0x1   :  { %10 = vsyncpa [#allocation4 + $0x1], 0 }
   0x2   :  { %11 = vsyncpa [#allocation7], 0 }
   0x3   :  { %12 = vsyncpa [#allocation5], 0 }
   0x4   :  { %14 = vsyncpa [#allocation5 + $0x1], 0  ;;  %s1219_s12 = smov 0   ;;  %s1221_s13 = smov 0  }
   0x5   :  { %s1223_s14 = smov 0   ;;  %s1225_s15 = smov 0  }
   0x6 LB: > { %s1240_s16 = sadd.s32 4294967295, %s1186_s15   ;;  %s811_s17 = sadd.s32 4294967294, %s1186_s15   ;;  %s1186_s15 = sphi %s1225_s15, %s1528_s15   ;;  %s1182_s14 = sphi %s1223_s14, %s1527_s14   ;;  %s1178_s13 = sphi %s1221_s13, %s1526_s13   ;;  %s1174_s12 = sphi %s1219_s12, %s1525_s12  }
   0x7   : > { %p40_p0 = scmp.ne.s32.totalorder %s1178_s13, %s1174_s12  ;;  %p1509_p1 = scmp.eq.s32.totalorder %s1240_s16, 0 }
   0x8   : > { %p112_p3 = scmp.eq.s32.totalorder %s811_s17, 1  ;;  %p812_p5 = scmp.ge.s32.totalorder %s1186_s15, 1 }
   0x9   : > { %p1249_p4 = por %p1509_p1, %p40_p0  ;;  %p119_p7 = scmp.lt.s32.totalorder %s1186_s15, 3 }
   0xa   : > { %p1254_p6 = por %p112_p3, %p40_p0  ;;  %s1188_s21 = smov [#allocation6]  }
   0xb   : > { %s1512_s18 = scalar_select %p1249_p4, 1, 0 }
   0xc   : > { %s1513_s19 = scalar_select %p1254_p6, 1, 0 }
   0xd   : > { %p1259_p8 = pnand %p812_p5, %p119_p7  ;;  %s131_s22 = sshll.u32 %s1188_s21, 4  ;;  %s1263_s22 = int_to_ptr.vmem [resolvable:$true] %s131_s22 }
   0xe   : > { %s1189_s24 = smov [#allocation8]   ;;  %s1030_s28 = scalar_lea.hbm %s1506_s1, 3072 }
   0xf   : > { %p928_p9 = pneg %p1259_p8  ;;  %s145_s25 = sshll.u32 %s1189_s24, 4  ;;  %s1274_s25 = int_to_ptr.vmem [resolvable:$true] %s145_s25 }
  0x10   : > { %p1031_p12 = scmp.ne.s32.totalorder %s1506_s1, %s1030_s28  ;;  %p1037_p5 = scmp.lt.u32.totalorder %s1030_s28, %s1506_s1 }
  0x11   : > { %p1270_p11 = pnand %p928_p9, %p1509_p1 }
  0x13   : > { %p1032_p13 = pneg %p1270_p11 }
  0x15   : > { %p1033_p0 = pnand %p1032_p13, %p1031_p12 }
  0x17   : > { %p1034_p3 = pneg %p1033_p0 }
  0x19   : > { %p1039_p7 = pnand %p1037_p5, %p1034_p3 }
  0x1b   : > { %1042 = shalt.err (!%p1039_p7)
}
  0x1c   : > { %s1043_s6 = scalar_lea.vmem %s1263_s22, 3072  ;;  %p1051_p2 = scmp.lt.s32.totalorder %s1263_s22, %s1263_s22 }
  0x1d   : > { %p1044_p9 = scmp.ne.s32.totalorder %s1263_s22, %s1043_s6  ;;  %p1052_p12 = scmp.lt.s32.totalorder %s1043_s6, %s1043_s6 }
  0x1f   : > { %p1046_p10 = pnand %p1044_p9, %p1032_p13  ;;  %p1053_p0 = por %p1052_p12, %p1051_p2 }
  0x21   : > { %p1047_p1 = pneg %p1046_p10 }
  0x23   : > { %p1054_p6 = pnand %p1053_p0, %p1047_p1 }
  0x25   : > { %1057 = shalt.err (!%p1054_p6)
}
  0x26   : > { %s1190_s7 = smov 192   ;;  %s1191_s8 = smov 12  }
  0x27   : > { %931 = dma.hbm_to_vmem [thread:$0]  (!%p1270_p11), %s1506_s1, 3072, %s1263_s22, [#allocation7], %s1190_s7, %s1190_s7, %s1191_s8  }
  0x28   : > { %s1058_s21 = scalar_lea.hbm %s1507_s2, 48 }
  0x29   : > { %p1059_p2 = scmp.ne.s32.totalorder %s1507_s2, %s1058_s21  ;;  %p1065_p10 = scmp.lt.u32.totalorder %s1058_s21, %s1507_s2 }
  0x2b   : > { %p1061_p1 = pnand %p1059_p2, %p1032_p13 }
  0x2d   : > { %p1062_p6 = pneg %p1061_p1 }
  0x2f   : > { %p1067_p3 = pnand %p1065_p10, %p1062_p6 }
  0x31   : > { %1070 = shalt.err (!%p1067_p3)
}
  0x32   : > { %s1071_s22 = scalar_lea.vmem %s1274_s25, 48  ;;  %s1078_s29 = scalar_lea.vmem %s1274_s25, 64 }
  0x33   : > { %p1072_p5 = scmp.ne.s32.totalorder %s1274_s25, %s1071_s22  ;;  %p1079_p12 = scmp.lt.s32.totalorder %s1274_s25, %s1274_s25 }
  0x34   : > { %p1080_p0 = scmp.lt.s32.totalorder %s1078_s29, %s1071_s22 }
  0x35   : > { %p1074_p7 = pnand %p1072_p5, %p1032_p13 }
  0x36   : > { %p1081_p2 = por %p1080_p0, %p1079_p12 }
  0x37   : > { %p1075_p9 = pneg %p1074_p7 }
  0x39   : > { %p1082_p1 = pnand %p1081_p2, %p1075_p9 }
  0x3b   : > { %1085 = shalt.err (!%p1082_p1)
}
  0x3c   : > { %934 = dma.hbm_to_vmem [thread:$0]  (!%p1270_p11), %s1507_s2, 48, %s1274_s25, [#allocation7]  }
  0x3d   : > { %s1330_s5 = sadd.s32 1, %s1186_s15   ;;  %s27_s23 = sadd.s32 1, %s1182_s14 }
  0x3e   : > { %s24_s6 = ssub.s32 %s1186_s15, %s1330_s5  ;;  %p34_p13 = scmp.ne.s32.totalorder %s1182_s14, %s1178_s13 }
  0x3f   : > { %p25_p6 = scmp.eq.s32.totalorder %s24_s6, 0  ;;  %p35_p10 = scmp.eq.s32.totalorder %s1186_s15, 0 }
  0x40   : > { %p1516_p3 = scmp.eq.s32.totalorder %s1240_s16, 1  ;;  %p945_p7 = scmp.lt.s32.totalorder %s1186_s15, 2 }
  0x41   : > { %s1346_s8 = scalar_select %p25_p6, %s1182_s14, %s27_s23  }
  0x42   : > { %p1340_p5 = por %p1516_p3, %p34_p13  ;;  %p36_p9 = por %p35_p10, %p34_p13 }
  0x43   : > { %s156_s9 = sand.u32 1, %s1182_s14   ;;  %s817_s25 = sshll.u32 %s1186_s15, 7 }
  0x44   : > { %s1517_s7 = scalar_select %p1340_p5, 1, 0 }
  0x45   : > { %s816_s10 = sshll.u32 %s156_s9, 3  ;;  %s1353_s21 = scalar_lea.hbm %s1505_s0, %s817_s25 }
  0x46   : > { %s160_s24 = scalar_lea.vmem [#allocation3], %s816_s10  ;;  %p1357_p11 = pnand %p945_p7, %p36_p9 }
  0x47   : > { %s167_s26 = sshll.u32 %s160_s24, 4  ;;  %s157_s28 = scalar_lea.sflag [#allocation4], %s156_s9  ;;  %s1355_s26 = int_to_ptr.vmem [resolvable:$true] %s167_s26 }
  0x48   : > { %s1086_s22 = scalar_lea.hbm %s1353_s21, 128  ;;  %p1088_p0 = pneg %p1357_p11 }
  0x49   : > { %p1087_p12 = scmp.ne.s32.totalorder %s1353_s21, %s1086_s22  ;;  %s1091_s4 = scalar_lea.hbm %s1505_s0, 256 }
  0x4a   : > { %p1092_p13 = scmp.lt.u32.totalorder %s1353_s21, %s1505_s0  ;;  %p1093_p6 = scmp.lt.u32.totalorder %s1091_s4, %s1086_s22 }
  0x4b   : > { %p1089_p2 = pnand %p1088_p0, %p1087_p12  ;;  %p1095_p3 = scmp.lt.u32.totalorder %s1086_s22, %s1353_s21 }
  0x4c   : > { %p1094_p10 = por %p1093_p6, %p1092_p13 }
  0x4d   : > { %p1090_p1 = pneg %p1089_p2 }
  0x4e   : > { %p1096_p7 = por %p1095_p3, %p1094_p10 }
  0x50   : > { %p1097_p9 = pnand %p1096_p7, %p1090_p1 }
  0x52   : > { %1100 = shalt.err (!%p1097_p9)
}
  0x53   : > { %s1101_s9 = scalar_lea.vmem %s1355_s26, 128  ;;  %s1192_s10 = smov [#allocation3]  }
  0x54   : > { %p1102_p12 = scmp.ne.s32.totalorder %s1355_s26, %s1101_s9  ;;  %s1106_s25 = sshll.u32 %s1192_s10, 4  ;;  %s1107_s25 = int_to_ptr.vmem [resolvable:$false] %s1106_s25 }
  0x55   : > { %s1108_s11 = scalar_lea.vmem %s1107_s25, 256  ;;  %p1109_p4 = scmp.lt.s32.totalorder %s1355_s26, %s1107_s25 }
  0x56   : > { %p1104_p2 = pnand %p1102_p12, %p1088_p0  ;;  %p1110_p13 = scmp.lt.s32.totalorder %s1108_s11, %s1101_s9 }
  0x58   : > { %p1105_p5 = pneg %p1104_p2  ;;  %p1111_p6 = por %p1110_p13, %p1109_p4 }
  0x5a   : > { %p1112_p10 = pnand %p1111_p6, %p1105_p5 }
  0x5c   : > { %1115 = shalt.err (!%p1112_p10)
}
  0x5d   : > { %938 = dma.hbm_to_vmem [thread:$0]  (!%p1357_p11), %s1353_s21, 128, %s1355_s26, %s157_s28  }
  0x5e   : > { %176 = sbr.rel (%p1259_p8) target bundleno = 1356 (0x54c), region = 32  ;;  %s1389_s17 = sand.u32 (!%p1259_p8), 1, %s1178_s13  }
  0x5f   : > { %s819_s24 = sshll.u32 (!%p1259_p8), %s1389_s17, 3  ;;  %s179_s22 = scalar_lea.sflag (!%p1259_p8), [#allocation4], %s1389_s17 }
  0x60   : > { %s1395_s29 = scalar_lea.vmem (!%p1259_p8), [#allocation3], %s819_s24  ;;  %p1519_p4 = scmp.ne.s32.totalorder (!%p1259_p8), %s1512_s18, 0 }
  0x65   : > { %1161 = dma.done.wait (%p1519_p4), %s179_s22, 128  }
  0x66   : > { %1163 = vsyncadd (%p1519_p4), %s179_s22, 4294967168  ;;  %p1520_p5 = scmp.eq.s32.totalorder %s1240_s16, 0 }
  0x68   : > { %1165 = dma.done.wait (%p1520_p5), [#allocation7], 3120   ;;  %p1521_p8 = pmov %p1520_p5 }
  0x69   : > { %v1193_v0 = vmov 0   ;;  %v990_v1 = vld [vmem:[#allocation6 + $0x4] ss:$12 sps:$4 sm:$0xff]   ;;  %v992_v2 = vld [vmem:[#allocation6] ss:$12 sps:$4 sm:$0xff]   ;;  %v1194_v19 = vmov 0.0   ;;  %v250_v20 = vlaneseq }
  0x6a   : > { %1167 = vsyncadd (%p1521_p8), [#allocation7], 4294964176  ;;  %425 = vmatprep.mubr.bf16.mxu0 %v1193_v0  ;;  %393 = vmatprep.subr.bf16.mxu0 %v990_v1  ;;  %v993_v3 = vld [vmem:[#allocation6 + $0x1c] ss:$12 sps:$4 sm:$0xff]   ;;  %v995_v4 = vld [vmem:[#allocation6 + $0x18] ss:$12 sps:$4 sm:$0xff]  }
  0x6b   : > { %394 = vmatpush1.bf16.msra.mxu0 %v992_v2  ;;  %v996_v5 = vld [vmem:[#allocation6 + $0x34] ss:$12 sps:$4 sm:$0xff]   ;;  %v998_v6 = vld [vmem:[#allocation6 + $0x30] ss:$12 sps:$4 sm:$0xff]   ;;  %v999_v7 = vld [vmem:[#allocation6 + $0x4c] ss:$12 sps:$4 sm:$0xff]   ;;  %872 = vmatprep.subr.bf16.mxu1 %v1194_v19 }
  0x6c   : > { %395 = vmatprep.subr.bf16.mxu0 %v993_v3  ;;  %v1001_v8 = vld [vmem:[#allocation6 + $0x48] ss:$12 sps:$4 sm:$0xff]   ;;  %v1002_v9 = vld [vmem:[#allocation6 + $0x64] ss:$12 sps:$4 sm:$0xff]   ;;  %v1004_v10 = vld [vmem:[#allocation6 + $0x60] ss:$12 sps:$4 sm:$0xff]  }
  0x6d   : > { %v1005_v11 = vld [vmem:[#allocation6 + $0x7c] ss:$12 sps:$4 sm:$0xff]   ;;  %v1007_v12 = vld [vmem:[#allocation6 + $0x78] ss:$12 sps:$4 sm:$0xff]   ;;  %v1008_v13 = vld [vmem:[#allocation6 + $0x94] ss:$12 sps:$4 sm:$0xff]  }
  0x6e   : > { %v1010_v14 = vld [vmem:[#allocation6 + $0x90] ss:$12 sps:$4 sm:$0xff]   ;;  %v1011_v15 = vld [vmem:[#allocation6 + $0xac] ss:$12 sps:$4 sm:$0xff]   ;;  %v1013_v16 = vld [vmem:[#allocation6 + $0xa8] ss:$12 sps:$4 sm:$0xff]  }
  0x6f   : > { %396 = vmatpush1.bf16.msra.mxu0 %v995_v4  ;;  %v214_v17 = vld [vmem:[%s1395_s29] sm:$0xff]  ;;  %vm1195_vm0 = vmmov 0   ;;  %v1412_v21 = vshrl.u32 %v250_v20, 7  ;;  %v1415_v23 = vld [vmem:[#allocation8] sm:$0x7]  ;;  %vm477_vm1 = vcmask 130048  }
  0x70   : > { %397 = vmatprep.subr.bf16.mxu0 %v996_v5  ;;  %v215_v18 = vpack.c.bf16 %v214_v17, %v214_v17  ;;  %888 = vmatprep.mubr.msk.bf16.mxu1 %vm1195_vm0, %v1194_v19  ;;  %s1196_s18 = smov 112   ;;  %v1014_v36 = vld [vmem:[#allocation6 + $0x8] ss:$12 sps:$4 sm:$0xff]   ;;  %v1015_v37 = vld [vmem:[#allocation6 + $0x20] ss:$12 sps:$4 sm:$0xff]   ;;  %vm524_vm2 = vcmask 64512  }
  0x71   : > { %v256_v22 = vsub.s32 1, %v1412_v21  ;;  %v252_v24 = vsub.s32 0, %v1412_v21  ;;  %873 = vmatpush3.bf16.msra.mxu1 %v1014_v36  ;;  %v1016_v38 = vld [vmem:[#allocation6 + $0x38] ss:$12 sps:$4 sm:$0xff]   ;;  %v1017_v39 = vld [vmem:[#allocation6 + $0x50] ss:$12 sps:$4 sm:$0xff]  }
  0x72   : > { %874 = vmatprep.subr.bf16.mxu1 %v1194_v19  ;;  %v1018_v40 = vld [vmem:[#allocation6 + $0x68] ss:$12 sps:$4 sm:$0xff]   ;;  %v1019_v41 = vld [vmem:[#allocation6 + $0x80] ss:$12 sps:$4 sm:$0xff]   ;;  %v1020_v44 = vld [vmem:[#allocation6 + $0x98] ss:$12 sps:$4 sm:$0xff]  }
  0x73   : > { %398 = vmatpush1.bf16.msra.mxu0 %v998_v6  ;;  %v257_v25 = vrot.slane %v1415_v23, %v256_v22  ;;  %v253_v26 = vrot.slane %v1415_v23, %v252_v24  ;;  %v1021_v45 = vld [vmem:[#allocation6 + $0xb0] ss:$12 sps:$4 sm:$0xff]   ;;  %v260_v60 = vsub.s32 2, %v1412_v21  ;;  %vm540_vm3 = vcmask 1043456   ;;  %s1197_s20 = smov 16   ;;  %s852_s21 = sshll.u32 %s1240_s16, 7 }
  0x74   : > { %399 = vmatprep.subr.bf16.mxu0 %v999_v7  ;;  %vm702_vm4 = vcmask 261248   ;;  %vm704_vm5 = vcmask 1047808   ;;  %s212_s26 = scalar_lea.vmem [#allocation9], %s819_s24  ;;  %s1461_s4 = scalar_lea.hbm %s1508_s3, %s852_s21 }
  0x75   : > { %875 = vmatpush3.bf16.msra.mxu1 %v1015_v37  ;;  %v261_v63 = vrot.slane %v1415_v23, %v260_v60  ;;  %s722_s27 = sshll.u32 %s212_s26, 4  ;;  %s709_s23 = scalar_lea.sflag [#allocation5], %s1389_s17  ;;  %s1463_s27 = int_to_ptr.vmem [resolvable:$true] %s722_s27 }
  0x76   : > { %876 = vmatprep.subr.bf16.mxu1 %v1194_v19  ;;  %s1116_s6 = scalar_lea.vmem %s1463_s27, 128  ;;  %p1522_p0 = scmp.ne.s32.totalorder %s1517_s7, 0 }
  0x77   : > { %400 = vmatpush1.bf16.msra.mxu0 %v1001_v8  ;;  %p1117_p11 = scmp.ne.s32.totalorder %s1463_s27, %s1116_s6  ;;  %s1198_s16 = smov [#allocation9]  }
  0x78   : > { %401 = vmatprep.subr.bf16.mxu0 %v1002_v9  ;;  %s1120_s9 = sshll.u32 %s1198_s16, 4  ;;  %s1121_s9 = int_to_ptr.vmem [resolvable:$false] %s1120_s9 }
  0x79   : > { %877 = vmatpush3.bf16.msra.mxu1 %v1016_v38  ;;  %p1118_p1 = pnand %p1117_p11, %p1522_p0  ;;  %s1122_s10 = scalar_lea.vmem %s1121_s9, 256 }
  0x7a   : > { %878 = vmatprep.subr.bf16.mxu1 %v1194_v19  ;;  %p1123_p7 = scmp.lt.s32.totalorder %s1463_s27, %s1121_s9  ;;  %p1124_p9 = scmp.lt.s32.totalorder %s1122_s10, %s1116_s6 }
  0x7b   : > { %402 = vmatpush1.bf16.msra.mxu0 %v1004_v10  ;;  %p1119_p3 = pneg %p1118_p1 }
  0x7c   : > { %403 = vmatprep.subr.bf16.mxu0 %v1005_v11  ;;  %p1125_p12 = por %p1124_p9, %p1123_p7 }
  0x7d   : > { %879 = vmatpush3.bf16.msra.mxu1 %v1017_v39 }
  0x7e   : > { %880 = vmatprep.subr.bf16.mxu1 %v1194_v19  ;;  %p1126_p2 = pnand %p1125_p12, %p1119_p3 }
  0x7f   : > { %404 = vmatpush1.bf16.msra.mxu0 %v1007_v12 }
  0x80   : > { %405 = vmatprep.subr.bf16.mxu0 %v1008_v13 }
  0x81   : > { %881 = vmatpush3.bf16.msra.mxu1 %v1018_v40 }
  0x82   : > { %882 = vmatprep.subr.bf16.mxu1 %v1194_v19 }
  0x83   : > { %406 = vmatpush1.bf16.msra.mxu0 %v1010_v14 }
  0x84   : > { %407 = vmatprep.subr.bf16.mxu0 %v1011_v15 }
  0x85   : > { %883 = vmatpush3.bf16.msra.mxu1 %v1019_v41 }
  0x86   : > { %884 = vmatprep.subr.bf16.mxu1 %v1194_v19 }
  0x87   : > { %408 = vmatpush1.bf16.msra.mxu0 %v1013_v16 }
  0x88   : > { %892 = vmatprep.subr.bf16.mxu0 %v1194_v19 }
  0x89   : > { %885 = vmatpush3.bf16.msra.mxu1 %v1020_v44 }
  0x8a   : > { %426 = vmatmul.mubr.bf16.vlgmr.msra.gmra.mrb[0].mxu0 %v215_v18  ;;  %886 = vmatprep.subr.bf16.mxu1 %v1194_v19 }
  0x8b   : > { %894 = vmatprep.mubr.msk.bf16.mxu0 %vm1195_vm0, %v1194_v19 }
  0x8d   : > { %887 = vmatpush3.bf16.msra.mxu1 %v1021_v45 }
  0x8e   : > { %898 = vmatprep.subr.bf16.mxu1 %v1194_v19 }
  0x90   : > { %889 = vmatmul.mubr.bf16.vlgmr.msra.gmra.mrb[0].mxu1 %v215_v18 }
  0x91   : > { %900 = vmatprep.mubr.msk.bf16.mxu1 %vm1195_vm0, %v1194_v19 }
 0x15d   : > { %v427_v27 = vpop.f32.mrb[0].mxu0 }
 0x15e   : > { %v429_v28 = vpop.f32.mrb[1].mxu0  ;;  %v428_v32 = vadd.f32 %v427_v27, %v253_v26 }
 0x15f   : > { %v430_v29 = vadd.f32 %v429_v28, %v257_v25  ;;  %v431_v30 = vpop.f32.mrb[2].mxu0 }
 0x160   : > { %v432_v31 = vpop.f32.mrb[3].mxu0  ;;  %v474_v35 = vpack.c.bf16 %v428_v32, %v428_v32 }
 0x161   : > { %v475_v33 = vpack.c.bf16 %v430_v29, %v430_v29 }
 0x163   : > { %v482_v34 = vsel %vm477_vm1, %v475_v33, 0  ;;  %589 = vrot.lane.b32.xlu0 %v475_v33, %s1196_s18  ;;  %v468_v61 = vpop.f32.mrb[0].mxu1 }
 0x164   : > { %893 = vmatpush3.bf16.xpose.msra.mxu0 %v482_v34  ;;  %v890_v62 = vpop.f32.mrb[1].mxu1  ;;  %v469_v2 = vadd.f32 %v468_v61, %v261_v63 }
 0x165   : > { %904 = vmatprep.subr.bf16.mxu0 %v1194_v19  ;;  %v471_v0 = vpop.f32.mrb[2].mxu1 }
 0x166   : > { %v891_v1 = vpop.f32.mrb[3].mxu1  ;;  %v476_v3 = vpack.c.bf16 %v469_v2, %v469_v2 }
 0x167   : > { %586 = vrot.lane.b32.xlu0 %v474_v35, %s1196_s18 }
 0x168   : > { %v542_v4 = vsel %vm540_vm3, %v476_v3, 0 }
 0x169   : > { %899 = vmatpush3.bf16.msra.mxu1 %v542_v4 }
 0x16a   : > { %910 = vmatprep.subr.bf16.mxu1 %v1194_v19 }
 0x16b   : > { %895 = vmatmul.mubr.msk.bf16.vlgmr.msra.gmra.mrb[4].mxu0 %vm477_vm1, %v474_v35 }
 0x16c   : > { %906 = vmatprep.mubr.msk.bf16.mxu0 %vm1195_vm0, %v1194_v19 }
 0x1d5   : > { %v590_v42 = vpop.permute.xlu0 %589 }
 0x1d6   : > { %v595_v43 = vsel %vm477_vm1, %v590_v42, 0 }
 0x1d7   : > { %905 = vmatpush3.bf16.xpose.msra.mxu0 %v595_v43 }
 0x1d9   : > { %v587_v46 = vpop.permute.xlu0 %586 }
 0x1de   : > { %907 = vmatmul.mubr.msk.bf16.vlgmr.msra.gmra.mrb[8].mxu0 %vm477_vm1, %v587_v46 }
 0x23e   : > { %v518_v47 = vpop.f32.mrb[4].mxu0 }
 0x23f   : > { %v896_v48 = vpop.f32.mrb[5].mxu0  ;;  %v525_v49 = vsel %vm524_vm2, %v518_v47, -inf }
 0x240   : > { %526 = vmax.xlane.f32.xlu1 %v525_v49  ;;  %v521_v50 = vpop.f32.mrb[6].mxu0 }
 0x241   : > { %v897_v51 = vpop.f32.mrb[7].mxu0 }
 0x2b1   : > { %v631_v52 = vpop.f32.mrb[8].mxu0 }
 0x2b2   : > { %v908_v53 = vpop.f32.mrb[9].mxu0  ;;  %v637_v54 = vsel %vm524_vm2, %v631_v52, -inf }
 0x2b3   : > { %638 = vmax.xlane.f32.xlu1 %v637_v54  ;;  %v634_v55 = vpop.f32.mrb[10].mxu0 }
 0x2b4   : > { %v909_v56 = vpop.f32.mrb[11].mxu0 }
 0x2cd   : > { %v527_v57 = vpop.xlane.xlu1 %526 }
 0x2ce   : > { %v528_v58 = vsub.f32 %v518_v47, %v527_v57 }
 0x2d0   : > { %v529_v59 = vmul.f32 1.442695, %v528_v58 }
 0x2d2   : > { %1022 = vpow2.f32 %v529_v59 }
 0x2dc   : > { %v1023_v5 = vpop.eup %1022 }
 0x2dd   : > { %v531_v6 = vsel %vm524_vm2, %v1023_v5, 0.0 }
 0x2de   : > { %532 = vadd.xlane.f32.xlu0 %v531_v6 }
 0x340   : > { %v639_v7 = vpop.xlane.xlu1 %638 }
 0x341   : > { %v640_v8 = vsub.f32 %v631_v52, %v639_v7 }
 0x343   : > { %v641_v9 = vmul.f32 1.442695, %v640_v8 }
 0x345   : > { %1024 = vpow2.f32 %v641_v9 }
 0x34f   : > { %v1025_v10 = vpop.eup %1024 }
 0x350   : > { %v643_v11 = vsel %vm524_vm2, %v1025_v10, 0.0 }
 0x351   : > { %644 = vadd.xlane.f32.xlu1 %v643_v11 }
 0x362   : > { %650 = vrot.lane.b32.xlu1 %v476_v3, %s1196_s18 }
 0x36b   : > { %v533_v12 = vpop.xlane.xlu0 %532 }
 0x36c   : > { %1026 = vrcp.f32 %v533_v12 }
 0x376   : > { %v1027_v13 = vpop.eup %1026 }
 0x377   : > { %v535_v14 = vmul.f32 %v1027_v13, %v1023_v5 }
 0x379   : > { %v536_v15 = vpack.c.bf16 %v535_v14, %v535_v14 }
 0x37b   : > { %901 = vmatmul.mubr.msk.bf16.vlgmr.msra.gmra.mrb[4].mxu1 %vm524_vm2, %v536_v15 }
 0x37c   : > { %912 = vmatprep.mubr.msk.bf16.mxu1 %vm1195_vm0, %v1194_v19 }
 0x3de   : > { %v645_v16 = vpop.xlane.xlu1 %644 }
 0x3df   : > { %1028 = vrcp.f32 %v645_v16 }
 0x3e2   : > { %v651_v17 = vpop.permute.xlu1 %650 }
 0x3e3   : > { %v656_v18 = vsel %vm540_vm3, %v651_v17, 0 }
 0x3e4   : > { %911 = vmatpush3.bf16.msra.mxu1 %v656_v18 }
 0x3e9   : > { %v1029_v20 = vpop.eup %1028 }
 0x3ea   : > { %v647_v21 = vmul.f32 %v1029_v20, %v1025_v10 }
 0x3ec   : > { %v648_v22 = vpack.c.bf16 %v647_v21, %v647_v21 }
 0x3ee   : > { %913 = vmatmul.mubr.msk.bf16.vlgmr.msra.gmra.mrb[8].mxu1 %vm524_vm2, %v648_v22 }
 0x44e   : > { %v578_v23 = vpop.f32.mrb[4].mxu1 }
 0x44f   : > { %584 = vst.msk [vmem:[#allocation2] sm:$0xff] %vm477_vm1, %v578_v23  ;;  %v902_v24 = vpop.f32.mrb[5].mxu1 }
 0x450   : > { %v581_v25 = vpop.f32.mrb[6].mxu1 }
 0x451   : > { %v903_v26 = vpop.f32.mrb[7].mxu1 }
 0x4c1   : > { %v692_v27 = vpop.f32.mrb[8].mxu1 }
 0x4c2   : > { %699 = vrot.lane.b32.xlu1 %v692_v27, %s1197_s20  ;;  %v914_v28 = vpop.f32.mrb[9].mxu1 }
 0x4c3   : > { %v695_v29 = vpop.f32.mrb[10].mxu1 }
 0x4c4   : > { %v915_v30 = vpop.f32.mrb[11].mxu1 }
 0x534   : > { %v700_v31 = vpop.permute.xlu1 %699 }
 0x535   : > { %703 = vst.msk [vmem:[#allocation2] sm:$0xff] %vm702_vm4, %v700_v31 }
 0x536   : > { %705 = vst.msk [vmem:[#allocation2] sm:$0xff] %vm704_vm5, %v1194_v19 }
 0x53d   : > { %v706_v32 = vld [vmem:[#allocation2] sm:$0xff] }
 0x53e   : > { %707 = vst [vmem:[%s212_s26] sm:$0xff] %v706_v32 }
 0x53f   : > { %1129 = shalt.err (!%p1126_p2)
}
 0x540   : > { %s1130_s25 = scalar_lea.hbm %s1461_s4, 128  ;;  %s1134_s24 = scalar_lea.hbm %s1508_s3, 256 }
 0x541   : > { %p1131_p13 = scmp.ne.s32.totalorder %s1461_s4, %s1130_s25  ;;  %p1135_p4 = scmp.lt.u32.totalorder %s1461_s4, %s1508_s3 }
 0x542   : > { %p1136_p5 = scmp.lt.u32.totalorder %s1134_s24, %s1130_s25  ;;  %p1138_p11 = scmp.lt.u32.totalorder %s1130_s25, %s1461_s4 }
 0x543   : > { %p1132_p6 = pnand %p1131_p13, %p1522_p0 }
 0x544   : > { %p1137_p8 = por %p1136_p5, %p1135_p4 }
 0x545   : > { %p1133_p10 = pneg %p1132_p6 }
 0x546   : > { %p1139_p1 = por %p1138_p11, %p1137_p8 }
 0x548   : > { %p1140_p3 = pnand %p1139_p1, %p1133_p10 }
 0x54a   : > { %1143 = shalt.err (!%p1140_p3)
}
 0x54b   : > { %926 = dma.vmem_to_hbm [thread:$0]  (%p1522_p0), %s1463_s27, 128, %s1461_s4, %s709_s23  }
 0x54c PF: > { %s734_s18 = sand.u32 1, %s1174_s12   ;;  %p1523_p7 = scmp.ne.s32.totalorder %s1513_s19, 0 }
 0x54d   : > { %p1524_p9 = scmp.ge.s32.totalorder %s1186_s15, 2  ;;  %s735_s20 = scalar_lea.sflag [#allocation5], %s734_s18 }
 0x54f   : > { %p940_p12 = pnand %p1524_p9, %p1523_p7 }
 0x551   : > { %1169 = dma.done.wait (!%p940_p12), %s735_s20, 128  }
 0x552   : > { %1171 = vsyncadd (!%p940_p12), %s735_s20, 4294967168  ;;  %p17_p2 = scmp.ge.s32.totalorder %s1330_s5, 4   ;;  %s1525_s12 = smov %s1178_s13 }
 0x553   : > { %s1526_s13 = smov %s1182_s14  ;;  %s1527_s14 = smov %s1346_s8 }
 0x554   : > { %s1528_s15 = smov %s1330_s5  ;;  %19 = sbr.rel (!%p17_p2) target bundleno = 6 (0x6), region = 85 }
 0x55b   :  { %740 = vsyncpa [#allocation4], 1 }
 0x55c   :  { %742 = vsyncpa [#allocation4 + $0x1], 1 }
 0x55d   :  { %743 = vsyncpa [#allocation7], 1 }
 0x55e   :  { %744 = vsyncpa [#allocation5], 1 }
 0x55f   :  { %746 = vsyncpa [#allocation5 + $0x1], 1 }

</bundles_post_ra>
